<compile_context>
chip_gen: v6e
topology: v6e:2x2x1
jax: 0.10.0
libtpu: 0.0.40
codegen_flags: <defaults>
</compile_context>

<pallas_src>
import functools

import jax
import jax.numpy as jnp
from jax.experimental import pallas as pl
from jax.experimental.pallas import tpu as pltpu

_SUBLANE = 8
_LANE = 128


# ----------------------------------------------------------------------------
# Kernel: grid = (M_blocks, N_blocks, K_blocks); K innermost (reduction).
# ----------------------------------------------------------------------------
def _fc_kernel(x_ref, w_ref, b_ref, o_ref, acc_ref, *, apply_relu):
    k = pl.program_id(2)

    @pl.when(k == 0)
    def _():
        acc_ref[...] = jnp.zeros_like(acc_ref)

    acc_ref[...] += jnp.dot(x_ref[...], w_ref[...],
                            preferred_element_type=jnp.float32)

    @pl.when(k == pl.num_programs(2) - 1)
    def _():
        out = acc_ref[...] + b_ref[...]            # (tm, tn) + (1, tn)
        if apply_relu:
            out = jnp.maximum(out, 0.0)
        o_ref[...] = out.astype(o_ref.dtype)


# ----------------------------------------------------------------------------
# Helpers
# ----------------------------------------------------------------------------
def _round_up(x, m):
    return ((x + m - 1) // m) * m


def _vmem_limit_bytes():
    """~75% of per-core VMEM: ~96 MiB on v5e/v6e (128 MiB), ~48 MiB on v7x (64 MiB)."""
    cap = 64 * 1024 * 1024                         # conservative (v7x-sized) fallback
    try:
        info = pltpu.get_tpu_info()
        cap = int(getattr(info, "vmem_capacity_bytes", cap) or cap)
    except Exception:
        pass
    limit = int(cap * 3 // 4)
    return max(32 * 1024 * 1024, min(limit, 100 * 1024 * 1024))


def _choose_tm(batch, tn, tk, in_bytes, out_bytes, vmem_limit):
    """Biggest M-tile (<=512, multiple of 8) whose double-buffered set fits VMEM."""
    budget = int(vmem_limit * 0.9)                 # headroom for compiler scratch

    def footprint(tm):
        return (2 * tm * tk * in_bytes             # x tiles (double-buffered)
                + 2 * tk * tn * in_bytes           # weight tiles
                + 2 * tm * tn * out_bytes          # output tiles
                + tm * tn * 4                      # f32 accumulator scratch
                + 2 * tn * 4)                      # bias tile

    tm = min(512, _round_up(batch, _SUBLANE))
    while tm > _SUBLANE and footprint(tm) > budget:
        tm = _round_up(tm // 2, _SUBLANE)
    return tm


def _fc_forward(x, w_t, b, *, out_features, tn, tk, out_dtype, apply_relu,
                vmem_limit):
    B, Kp = x.shape
    Kp_w, Outp = w_t.shape
    assert Kp == Kp_w and Kp % tk == 0 and Outp % tn == 0

    in_bytes = x.dtype.itemsize
    out_bytes = jnp.dtype(out_dtype).itemsize
    tm = _choose_tm(B, tn, tk, in_bytes, out_bytes, vmem_limit)

    # Give v7x's second TensorCore its own M-tile on small/medium problems.
    if pl.cdiv(B, tm) * (Outp // tn) == 1 and B >= 2 * _SUBLANE:
        tm = _round_up(pl.cdiv(B, 2), _SUBLANE)

    grid = (pl.cdiv(B, tm), Outp // tn, Kp // tk)
    kernel = functools.partial(_fc_kernel, apply_relu=apply_relu)

    return pl.pallas_call(
        kernel,
        out_shape=jax.ShapeDtypeStruct((B, out_features), out_dtype),
        grid_spec=pltpu.PrefetchScalarGridSpec(
            num_scalar_prefetch=0,
            grid=grid,
            in_specs=[
                pl.BlockSpec((tm, tk), lambda i, j, k: (i, k)),     # x
                pl.BlockSpec((tk, tn), lambda i, j, k: (k, j)),     # weight
                pl.BlockSpec((1, tn), lambda i, j, k: (0, j)),      # bias
            ],
            out_specs=pl.BlockSpec((tm, tn), lambda i, j, k: (i, j)),
            scratch_shapes=[pltpu.VMEM((tm, tn), jnp.float32)],
        ),
        compiler_params=pltpu.CompilerParams(
            dimension_semantics=("parallel", "parallel", "arbitrary"),
            vmem_limit_bytes=vmem_limit,
        ),
        cost_estimate=pl.CostEstimate(
            flops=2 * B * Kp * Outp,
            transcendentals=0,
            bytes_accessed=(in_bytes * (B * Kp + Kp * Outp)
                            + 4 * Outp + out_bytes * B * out_features),
        ),
    )(x, w_t, b)


# ----------------------------------------------------------------------------
# Module
# ----------------------------------------------------------------------------
class FullyConnected:
    """Pallas-TPU port of models/ppgn.py::FullyConnected (Linear + ReLU).

    Parameters are prepared once at construction: xavier-uniform weight with
    PyTorch semantics, stored pre-transposed (in, out), zero-padded to tile
    multiples and pre-cast to the compute dtype, so the forward pass never
    touches the weight outside the kernel.
    """

    def __init__(self, key, in_features, out_features, *, activation="relu",
                 use_bf16=False, out_dtype=jnp.float32):
        # TODO(synk): only ReLU / None activations are fused in the epilogue;
        # arbitrary activation_fn callables are not supported.
        assert activation in ("relu", None)
        self.in_features = int(in_features)
        self.out_features = int(out_features)
        self.apply_relu = activation == "relu"
        self.use_bf16 = bool(use_bf16)
        self.out_dtype = jnp.dtype(out_dtype)
        self.param_dtype = jnp.dtype(jnp.bfloat16 if use_bf16 else jnp.float32)
        self.vmem_limit = _vmem_limit_bytes()

        # --- N/K tiles fixed at init (M is picked per batch size) -----------
        # Whole reduction as one K tile when modest (no K padding at all);
        # otherwise 512-wide K chunks (multiple of 128) with zero-padded K.
        self.tk = self.in_features if self.in_features <= 2048 else 512
        tn_cap = 2048 if self.use_bf16 else 1024
        self.tn = min(tn_cap, _round_up(self.out_features, _LANE))

        k_pad = _round_up(self.in_features, self.tk)
        n_pad = _round_up(self.out_features, self.tn)
        self.k_padded = k_pad

        # --- parameters: xavier_uniform on the (out, in) weight, zero bias --
        bound = (6.0 / (self.in_features + self.out_features)) ** 0.5
        w = jax.random.uniform(key, (self.out_features, self.in_features),
                               minval=-bound, maxval=bound, dtype=jnp.float32)
        w_t = jnp.pad(jnp.transpose(w),
                      ((0, k_pad - self.in_features),
                       (0, n_pad - self.out_features)))
        self.w_t = w_t.astype(self.param_dtype)        # (k_pad, n_pad)
        self.b = jnp.zeros((1, n_pad), jnp.float32)    # bias kept f32

    def __call__(self, x):
        lead = x.shape[:-1]
        assert x.shape[-1] == self.in_features
        x2 = x.reshape(-1, self.in_features)
        if x2.dtype != self.param_dtype:
            x2 = x2.astype(self.param_dtype)
        if self.k_padded != self.in_features:          # only K must be padded
            x2 = jnp.pad(x2, ((0, 0), (0, self.k_padded - self.in_features)))
        out = _fc_forward(x2, self.w_t, self.b,
                          out_features=self.out_features,
                          tn=self.tn, tk=self.tk,
                          out_dtype=self.out_dtype,
                          apply_relu=self.apply_relu,
                          vmem_limit=self.vmem_limit)
        return out.reshape(*lead, self.out_features)


# ----------------------------------------------------------------------------
# Self-test
# ----------------------------------------------------------------------------
if __name__ == "__main__":
    key = jax.random.PRNGKey(0)
    k_w1, k_x1, k_w2, k_x2 = jax.random.split(key, 4)

    # --- 1) small module-scale shape ----------------------------------------
    B1, In1, Out1 = 8, 32, 128
    fc1 = FullyConnected(k_w1, In1, Out1)
    x1 = jax.random.normal(k_x1, (B1, In1), dtype=jnp.float32)
    out1 = jax.block_until_ready(fc1(x1))
    w1 = fc1.w_t[:In1, :Out1].astype(jnp.float32)
    ref1 = jnp.maximum(
        jnp.dot(x1, w1, precision=jax.lax.Precision.HIGHEST) + fc1.b[:, :Out1],
        0.0)
    assert out1.shape == (B1, Out1)
    assert jnp.allclose(out1, ref1, atol=1e-5, rtol=1e-5)

    # --- 2) ragged shape: masked M/N edge blocks, >=2 M-tiles (v7x TCs) -----
    B2, In2, Out2 = 200, 300, 260
    fc2 = FullyConnected(k_w2, In2, Out2)
    x2 = jax.random.normal(k_x2, (B2, In2), dtype=jnp.float32)
    out2 = jax.block_until_ready(fc2(x2))
    w2 = fc2.w_t[:In2, :Out2].astype(jnp.float32)
    ref2 = jnp.maximum(
        jnp.dot(x2, w2, precision=jax.lax.Precision.HIGHEST) + fc2.b[:, :Out2],
        0.0)
    assert out2.shape == (B2, Out2)
    assert jnp.allclose(out2, ref2, atol=2e-2, rtol=2e-2)

    # --- 3) bf16 operands (f32 accumulate), weight pre-cast at init ---------
    fc3 = FullyConnected(k_w2, In2, Out2, use_bf16=True)
    out3 = jax.block_until_ready(fc3(x2))
    x2b = x2.astype(jnp.bfloat16).astype(jnp.float32)
    w3 = fc3.w_t[:In2, :Out2].astype(jnp.float32)
    ref3 = jnp.maximum(
        jnp.dot(x2b, w3, precision=jax.lax.Precision.HIGHEST) + fc3.b[:, :Out2],
        0.0)
    assert out3.shape == (B2, Out2)
    assert jnp.allclose(out3, ref3, atol=5e-2, rtol=5e-2)

    print("KERNEL_OK")
</pallas_src>

<mosaic_0001>
module attributes {stable_mosaic.version = 11 : i64} {
  func.func @_fc_kernel(%arg0: i32, %arg1: i32, %arg2: i32, %arg3: memref<8x32xf32, #tpu.memory_space<vmem>>, %arg4: memref<32x128xf32, #tpu.memory_space<vmem>>, %arg5: memref<1x128xf32, #tpu.memory_space<vmem>>, %arg6: memref<8x128xf32, #tpu.memory_space<vmem>>, %arg7: memref<8x128xf32, #tpu.memory_space<vmem>>) attributes {dimension_semantics = [#tpu.dimension_semantics<parallel>, #tpu.dimension_semantics<parallel>, #tpu.dimension_semantics<arbitrary>], iteration_bounds = array<i64: 1, 1, 1>, scalar_prefetch = 0 : i64, scratch_operands = 1 : i64, tpu.core_type = #tpu.core_type<tc>, window_params = [{transform_indices = @transform_0, window_bounds = array<i64: 8, 32>}, {transform_indices = @transform_1, window_bounds = array<i64: 32, 128>}, {transform_indices = @transform_2, window_bounds = array<i64: 1, 128>}, {transform_indices = @transform_3, window_bounds = array<i64: 8, 128>}]} {
    %c0_i32 = arith.constant 0 : i32
    %0 = arith.cmpi eq, %arg2, %c0_i32 : i32
    %1 = arith.extui %0 : i1 to i32
    %c0_i32_0 = arith.constant 0 : i32
    %2 = arith.cmpi ne, %1, %c0_i32_0 : i32
    scf.if %2 {
      %cst_10 = arith.constant 0.000000e+00 : f32
      %12 = vector.broadcast %cst_10 : f32 to vector<8x128xf32>
      %c0_11 = arith.constant 0 : index
      %c0_12 = arith.constant 0 : index
      %13 = vector.load %arg7[%c0_11, %c0_12] : memref<8x128xf32, #tpu.memory_space<vmem>>, vector<8x128xf32>
      tpu.vector_store %arg7[%c0_11, %c0_12], %12 {strides = array<i32>} : memref<8x128xf32, #tpu.memory_space<vmem>>, vector<8x128xf32>,
    } else {
    }
    %c0 = arith.constant 0 : index
    %c0_1 = arith.constant 0 : index
    %3 = vector.load %arg7[%c0, %c0_1] : memref<8x128xf32, #tpu.memory_space<vmem>>, vector<8x128xf32>
    %c0_2 = arith.constant 0 : index
    %c0_3 = arith.constant 0 : index
    %4 = vector.load %arg3[%c0_2, %c0_3] : memref<8x32xf32, #tpu.memory_space<vmem>>, vector<8x32xf32>
    %c0_4 = arith.constant 0 : index
    %c0_5 = arith.constant 0 : index
    %5 = vector.load %arg4[%c0_4, %c0_5] : memref<32x128xf32, #tpu.memory_space<vmem>>, vector<32x128xf32>
    %cst = arith.constant dense<0.000000e+00> : vector<8x128xf32>
    %6 = tpu.matmul %4, %5, %cst {dimension_numbers = #tpu.dot_dimension_numbers<[1], [0], [0], [1], [0, 0, 1, 1], [], []>} : vector<8x32xf32>, vector<32x128xf32>, vector<8x128xf32> -> vector<8x128xf32>
    %7 = arith.addf %3, %6 : vector<8x128xf32>
    %c0_6 = arith.constant 0 : index
    %c0_7 = arith.constant 0 : index
    %8 = vector.load %arg7[%c0_6, %c0_7] : memref<8x128xf32, #tpu.memory_space<vmem>>, vector<8x128xf32>
    tpu.vector_store %arg7[%c0_6, %c0_7], %7 {strides = array<i32>} : memref<8x128xf32, #tpu.memory_space<vmem>>, vector<8x128xf32>,
    %c0_i32_8 = arith.constant 0 : i32
    %9 = arith.cmpi eq, %arg2, %c0_i32_8 : i32
    %10 = arith.extui %9 : i1 to i32
    %c0_i32_9 = arith.constant 0 : i32
    %11 = arith.cmpi ne, %10, %c0_i32_9 : i32
    scf.if %11 {
      %c0_10 = arith.constant 0 : index
      %c0_11 = arith.constant 0 : index
      %12 = vector.load %arg7[%c0_10, %c0_11] : memref<8x128xf32, #tpu.memory_space<vmem>>, vector<8x128xf32>
      %c0_12 = arith.constant 0 : index
      %c0_13 = arith.constant 0 : index
      %13 = vector.load %arg5[%c0_12, %c0_13] : memref<1x128xf32, #tpu.memory_space<vmem>>, vector<1x128xf32>
      %14 = vector.broadcast %13 : vector<1x128xf32> to vector<8x128xf32>
      %15 = arith.addf %12, %14 : vector<8x128xf32>
      %cst_14 = arith.constant 0.000000e+00 : f32
      %16 = vector.broadcast %cst_14 : f32 to vector<8x128xf32>
      %17 = arith.maximumf %15, %16 : vector<8x128xf32>
      %c0_15 = arith.constant 0 : index
      %c0_16 = arith.constant 0 : index
      %18 = vector.load %arg6[%c0_15, %c0_16] : memref<8x128xf32, #tpu.memory_space<vmem>>, vector<8x128xf32>
      tpu.vector_store %arg6[%c0_15, %c0_16], %17 {strides = array<i32>} : memref<8x128xf32, #tpu.memory_space<vmem>>, vector<8x128xf32>,
    } else {
    }
    return
  }
  func.func @transform_0(%arg0: i32, %arg1: i32, %arg2: i32) -> (i32, i32) {
    %c0_i32 = arith.constant 0 : i32
    return %arg0, %arg2 : i32, i32
  }
  func.func @transform_1(%arg0: i32, %arg1: i32, %arg2: i32) -> (i32, i32) {
    %c0_i32 = arith.constant 0 : i32
    return %arg2, %arg1 : i32, i32
  }
  func.func @transform_2(%arg0: i32, %arg1: i32, %arg2: i32) -> (i32, i32) {
    %c0_i32 = arith.constant 0 : i32
    %c0_i32_0 = arith.constant 0 : i32
    return %c0_i32, %arg1 : i32, i32
  }
  func.func @transform_3(%arg0: i32, %arg1: i32, %arg2: i32) -> (i32, i32) {
    %c0_i32 = arith.constant 0 : i32
    return %arg0, %arg1 : i32, i32
  }
}

</mosaic_0001>

<bundles_post_ra>
// kernel: tpu_custom_call.1
= control target key start
LH: loop header
LB: loop body
LE: loop exit
PB: predicated region body
PF: predicated region fallthrough
CT: control target
= control target key end

     0   :  { %8 = vsyncpa [#allocation4], 0  ;;  %s288_s0 = inlined_call_operand.hbm [shape: f32[8,32], index: 0, kind: input, shape index: {}]   ;;  %s289_s1 = inlined_call_operand.hbm [shape: f32[32,128], index: 1, kind: input, shape index: {}]   ;;  %s290_s2 = inlined_call_operand.vmem [shape: f32[1,128], index: 2, kind: input, shape index: {}]   ;;  %s291_s3 = inlined_call_operand.hbm [shape: f32[8,128], index: 3, kind: output, shape index: {}]  }
   0x1   :  { %9 = vsyncpa [#allocation7], 0 }
   0x2   :  { %10 = vsyncpa [#allocation5], 0  ;;  %s249_s12 = smov [#allocation3]   ;;  %s250_s14 = smov [#allocation6]  }
   0x3   :  { %s17_s13 = sshll.u32 %s249_s12, 4  ;;  %s26_s15 = sshll.u32 %s250_s14, 4  ;;  %s18_s13 = int_to_ptr.vmem [resolvable:$true] %s17_s13  ;;  %s27_s15 = int_to_ptr.vmem [resolvable:$true] %s26_s15 }
   0x4   :  { %s191_s16 = scalar_lea.vmem %s18_s13, 128  ;;  %p196_p1 = scmp.lt.s32.totalorder %s18_s13, %s18_s13 }
   0x5   :  { %p192_p0 = scmp.ne.s32.totalorder %s18_s13, %s191_s16  ;;  %p197_p2 = scmp.lt.s32.totalorder %s191_s16, %s191_s16 }
   0x7   :  { %p198_p3 = por %p197_p2, %p196_p1 }
   0x9   :  { %p199_p4 = pnand %p198_p3, %p192_p0 }
   0xb   :  { %202 = shalt.err (!%p199_p4)
}
   0xc   :  { %20 = dma.hbm_to_vmem [thread:$0]  %s288_s0, 128, %s18_s13, [#allocation4]  }
   0xd   :  { %s211_s19 = scalar_lea.vmem %s27_s15, 512  ;;  %p216_p6 = scmp.lt.s32.totalorder %s27_s15, %s27_s15 }
   0xe   :  { %p212_p5 = scmp.ne.s32.totalorder %s27_s15, %s211_s19  ;;  %p217_p7 = scmp.lt.s32.totalorder %s211_s19, %s211_s19 }
  0x10   :  { %p218_p8 = por %p217_p7, %p216_p6 }
  0x12   :  { %p219_p9 = pnand %p218_p8, %p212_p5 }
  0x14   :  { %222 = shalt.err (!%p219_p9)
}
  0x15   :  { %s251_s20 = smov 128   ;;  %s252_s21 = smov 8  }
  0x16   :  { %32 = dma.hbm_to_vmem [thread:$0]  %s289_s1, 512, %s27_s15, [#allocation7], %s251_s20, %s251_s20, %s252_s21  }
  0x17   :  { %243 = dma.done.wait [#allocation4], 128  }
  0x18   :  { %244 = vsyncadd [#allocation4], 4294967168 }
  0x19   :  { %245 = dma.done.wait [#allocation7], 512  }
  0x1a   :  { %246 = vsyncadd [#allocation7], 4294966784  ;;  %v253_v0 = vmov 0.0   ;;  %vm254_vm0 = vmmov 0   ;;  %v51_v1 = vld [vmem:[#allocation6 + $0x18] sm:$0xff]  ;;  %v50_v2 = vld [vmem:[#allocation6 + $0x10] sm:$0xff] }
  0x1b   :  { %165 = vmatprep.subr.mxu0 %v253_v0  ;;  %173 = vmatprep.mubr.msk.f32.mxu0 %vm254_vm0, %v253_v0  ;;  %v49_v3 = vld [vmem:[#allocation6 + $0x8] sm:$0xff]  ;;  %v48_v4 = vld [vmem:[#allocation6] sm:$0xff]  ;;  %v47_v5 = vld [vmem:[#allocation3] sm:$0xff]  ;;  %vm52_vm1 = vcmask 261120   ;;  %s255_s24 = smov [#allocation8]  }
  0x1c   :  { %166 = vmatpush3.msra.mxu0 %v51_v1  ;;  %v159_v6 = vld [vmem:[%s290_s2] ss:$0 sm:$0xff]  ;;  %s148_s25 = sshll.u32 %s255_s24, 4  ;;  %s149_s25 = int_to_ptr.vmem [resolvable:$true] %s148_s25 }
  0x1d   :  { %167 = vmatprep.subr.mxu0 %v253_v0  ;;  %s223_s26 = scalar_lea.vmem %s149_s25, 128  ;;  %p228_p11 = scmp.lt.s32.totalorder %s149_s25, %s149_s25 }
  0x1e   :  { %168 = vmatpush3.msra.mxu0 %v50_v2  ;;  %p224_p10 = scmp.ne.s32.totalorder %s149_s25, %s223_s26  ;;  %p229_p12 = scmp.lt.s32.totalorder %s223_s26, %s223_s26 }
  0x1f   :  { %169 = vmatprep.subr.mxu0 %v253_v0 }
  0x20   :  { %170 = vmatpush3.msra.mxu0 %v49_v3  ;;  %p230_p13 = por %p229_p12, %p228_p11 }
  0x21   :  { %171 = vmatprep.subr.mxu0 %v253_v0 }
  0x22   :  { %172 = vmatpush3.msra.mxu0 %v48_v4  ;;  %p231_p0 = pnand %p230_p13, %p224_p10 }
  0x23   :  { %174 = vmatmul.mubr.msk.f32.vlgmr.msra.gmra.mxu0 %vm52_vm1, %v47_v5 }
  0xe3   :  { %v122_v7 = vpop.f32.mrf.mxu0 }
  0xe4   :  { %v139_v8 = vadd.f32 %v159_v6, %v122_v7 }
  0xe5   :  { %v175_v9 = vpop.f32.mrf.mxu0 }
  0xe6   :  { %v140_v10 = vmax.f32 %v139_v8, 0.0 }
  0xe8   :  { %141 = vst [vmem:[#allocation8] sm:$0xff] %v140_v10 }
  0xe9   :  { %234 = shalt.err (!%p231_p0)
}
  0xea   :  { %151 = dma.vmem_to_hbm [thread:$0]  %s149_s25, 128, %s291_s3, [#allocation5]  }
  0xeb   :  { %247 = dma.done.wait [#allocation5], 128  }
  0xec   :  { %248 = vsyncadd [#allocation5], 4294967168 }
  0xed   :  { %155 = vsyncpa [#allocation4], 1 }
  0xee   :  { %156 = vsyncpa [#allocation7], 1 }
  0xef   :  { %157 = vsyncpa [#allocation5], 1 }

</bundles_post_ra>
